<compile_context>
chip_gen: v7x
topology: tpu7x:2x2x1
jax: 0.10.0
libtpu: 0.0.40
codegen_flags: <defaults>
</compile_context>

<pallas_src>
import functools

import jax
import jax.numpy as jnp
from jax.experimental import pallas as pl
from jax.experimental.pallas import tpu as pltpu

_MIB = 1024 * 1024


def _round_up(x, m):
    return ((x + m - 1) // m) * m


# ---------------------------------------------------------------------------
# Kernel bodies
# ---------------------------------------------------------------------------
def _online_tile_update(logits, lmask, pos, invden_ref, o_ref,
                        m_scr, l_scr, s_scr, *, i, tm, na, scale, exp_dtype):
    """One (tm, tk) column tile of the online-softmax SupCon recurrence."""
    kv = pl.program_id(1)

    @pl.when(kv == 0)
    def _init():
        m_scr[...] = jnp.full_like(m_scr, -jnp.inf)
        l_scr[...] = jnp.zeros_like(l_scr)
        s_scr[...] = jnp.zeros_like(s_scr)

    m_prev = m_scr[...]
    m_new = jnp.maximum(m_prev, jnp.max(logits, axis=1, keepdims=True))
    alpha = jnp.exp(m_prev - m_new)                                # (tm, 1)

    # exp on the EUP; bf16 on v6e/v7x (2x throughput), f32 on v5e.
    p = jnp.exp((logits - m_new).astype(exp_dtype)).astype(jnp.float32)
    l_scr[...] = alpha * l_scr[...] + jnp.sum(
        jnp.where(lmask, p, 0.0), axis=1, keepdims=True)
    # sum(mask * raw_logits): linear, the max shift cancels at the end.
    s_scr[...] = s_scr[...] + jnp.sum(
        jnp.where(pos, logits, 0.0), axis=1, keepdims=True)
    m_scr[...] = m_new

    @pl.when(kv == pl.num_programs(1) - 1)
    def _finalize():
        # mean_log_prob_pos = sum(mask*logits)/den - (m + log l)
        # den == 0 (anchor with no positives) -> inv_den = inf -> NaN,
        # matching the PyTorch module's behaviour.
        mean_lpp = (s_scr[...] * invden_ref[...]
                    - m_scr[...] - jnp.log(l_scr[...]))
        loss_rows = (-scale) * mean_lpp                            # (tm, 1)
        valid = (i * tm + jax.lax.broadcasted_iota(jnp.int32, (tm, 1), 0)) < na
        loss_rows = jnp.where(valid, loss_rows, 0.0)
        # Lane-dense writeback: one full (8, 128) vreg per row tile holding
        # the tile's partial loss sum (single unmasked vst).
        o_ref[...] = jnp.broadcast_to(jnp.sum(loss_rows), o_ref.shape)


def _supcon_kernel_labels(alab_ref, clab_ref, invden_ref, anchor_ref,
                          contrast_ref, o_ref, m_scr, l_scr, s_scr, *,
                          na, nc, inv_temp, scale, exp_dtype):
    i = pl.program_id(0)
    kv = pl.program_id(1)
    tm = anchor_ref.shape[0]
    tk = contrast_ref.shape[0]

    # bf16 x bf16 -> f32 accumulate; contract on the feature dim (A @ B^T).
    logits = jax.lax.dot_general(
        anchor_ref[...], contrast_ref[...],
        dimension_numbers=(((1,), (1,)), ((), ())),
        preferred_element_type=jnp.float32) * inv_temp             # (tm, tk)

    row_g = i * tm + jax.lax.broadcasted_iota(jnp.int32, (tm, tk), 0)
    col_g = kv * tk + jax.lax.broadcasted_iota(jnp.int32, (tm, tk), 1)
    lmask = (row_g != col_g) & (col_g < nc)          # self + column padding
    pos = (alab_ref[...] == clab_ref[...]) & lmask   # bool, no f32 mask

    _online_tile_update(logits, lmask, pos, invden_ref, o_ref,
                        m_scr, l_scr, s_scr, i=i, tm=tm, na=na,
                        scale=scale, exp_dtype=exp_dtype)


def _supcon_kernel_mask(mask_ref, invden_ref, anchor_ref, contrast_ref,
                        o_ref, m_scr, l_scr, s_scr, *,
                        na, nc, inv_temp, scale, exp_dtype):
    i = pl.program_id(0)
    kv = pl.program_id(1)
    tm = anchor_ref.shape[0]
    tk = contrast_ref.shape[0]

    logits = jax.lax.dot_general(
        anchor_ref[...], contrast_ref[...],
        dimension_numbers=(((1,), (1,)), ((), ())),
        preferred_element_type=jnp.float32) * inv_temp             # (tm, tk)

    row_g = i * tm + jax.lax.broadcasted_iota(jnp.int32, (tm, tk), 0)
    col_g = kv * tk + jax.lax.broadcasted_iota(jnp.int32, (tm, tk), 1)
    lmask = (row_g != col_g) & (col_g < nc)
    pos = (mask_ref[...] != 0) & lmask               # int8 mask -> bool

    _online_tile_update(logits, lmask, pos, invden_ref, o_ref,
                        m_scr, l_scr, s_scr, i=i, tm=tm, na=na,
                        scale=scale, exp_dtype=exp_dtype)


# ---------------------------------------------------------------------------
# Wrapper
# ---------------------------------------------------------------------------
def supcon_loss(features, labels=None, mask=None, *,
                temperature=0.07, contrast_mode='all', base_temperature=0.07,
                block_m=256, block_n=2048, exp_in_bf16=None):
    """JAX/Pallas port of SupConLoss.forward.

    Args:
      features: [bsz, n_views, ...] array (extra dims are flattened).
      labels:   optional [bsz] int array.
      mask:     optional [bsz, bsz] 0/1 array (can be asymmetric).
    Returns:
      scalar float32 loss.
    """
    if features.ndim < 3:
        raise ValueError('`features` needs to be [bsz, n_views, ...], '
                         'at least 3 dimensions are required')
    if features.ndim > 3:
        features = features.reshape(features.shape[0], features.shape[1], -1)
    bsz, n_views, dim = features.shape

    if labels is not None and mask is not None:
        raise ValueError('Cannot define both `labels` and `mask`')

    use_labels = mask is None
    if use_labels:
        if labels is None:
            labels_eff = jnp.arange(bsz, dtype=jnp.int32)   # SimCLR identity
        else:
            labels_eff = jnp.asarray(labels).reshape(-1).astype(jnp.int32)
            if labels_eff.shape[0] != bsz:
                raise ValueError('Num of labels does not match num of features')
    else:
        # TODO(synk): explicit `mask=` is treated as binary (the documented
        # contract); fractional positive weights are not supported here.
        mask_bool = (jnp.asarray(mask) != 0)

    # torch.cat(torch.unbind(features, dim=1), dim=0)
    contrast_feature = jnp.concatenate(
        [features[:, v, :] for v in range(n_views)], axis=0)        # (nc, dim)
    if contrast_mode == 'one':
        anchor_feature, anchor_count = features[:, 0, :], 1
    elif contrast_mode == 'all':
        anchor_feature, anchor_count = contrast_feature, n_views
    else:
        raise ValueError('Unknown mode: {}'.format(contrast_mode))

    nc = n_views * bsz
    na = anchor_count * bsz

    # --- per-anchor positive counts (self excluded), O(N) host-side ---------
    if use_labels:
        same = jnp.sum(labels_eff[:, None] == labels_eff[None, :],
                       axis=1).astype(jnp.float32)                  # (bsz,)
        den_b = n_views * same - 1.0
    else:
        mask_f = mask_bool.astype(jnp.float32)
        den_b = n_views * jnp.sum(mask_f, axis=1) - jnp.diagonal(mask_f)
    den = jnp.tile(den_b, anchor_count)                              # (na,)
    inv_den = (1.0 / den).reshape(na, 1).astype(jnp.float32)

    # --- hardware detection ---------------------------------------------------
    kind = ""
    try:
        kind = jax.devices()[0].device_kind.lower()
    except Exception:  # pragma: no cover
        pass
    is_v7 = "v7" in kind
    if exp_in_bf16 is None:
        exp_in_bf16 = ("v6" in kind) or ("v7" in kind)   # no bf16 EUP on v5e
    exp_dtype = jnp.bfloat16 if exp_in_bf16 else jnp.float32

    # --- tiling ----------------------------------------------------------------
    row_align = 16 if use_labels else 32   # bf16 anchors (16); int8 mask (32)
    dim_pad = _round_up(dim, 128)

    na_pad = _round_up(na, row_align)
    tm = _round_up(min(max(int(block_m), row_align), na_pad), row_align)
    # Megacore: prefer >= 2 row tiles so both TensorCores get work.
    if tm >= na_pad and na_pad >= 2 * row_align:
        tm = _round_up(pl.cdiv(na_pad, 2), row_align)

    nc_pad128 = _round_up(nc, 128)
    max_tk = max(128, min(int(block_n), nc_pad128))
    tk = _round_up(pl.cdiv(nc_pad128, pl.cdiv(nc_pad128, max_tk)), 128)

    def vmem_est(tm_, tk_):
        est = 2 * tm_ * dim_pad * 2            # anchor tile, 2x buffered bf16
        est += 2 * tk_ * dim_pad * 2           # contrast tile, 2x buffered bf16
        est += 4 * tm_ * tk_ * 4               # f32 temporaries (logits/exp/selects)
        est += 2 * tm_ * tk_                   # boolean masks
        if not use_labels:
            est += 2 * tm_ * tk_               # int8 mask tile, 2x buffered
        est += 6 * tm_ * 128 * 4               # (tm,1) inputs/scratch (lane-padded)
        est += 2 * 8 * tk_ * 4                 # contrast-label tile
        est += 2 * 8 * 128 * 4                 # output tile
        return est

    budget = (36 if is_v7 else 64) * _MIB
    while vmem_est(tm, tk) > budget and tk > 512:
        tk = _round_up(tk // 2, 128)
    while vmem_est(tm, tk) > budget and tm > 4 * row_align:
        tm = _round_up(tm // 2, row_align)

    na_pad = _round_up(na_pad, tm)
    nc_pad = _round_up(nc, tk)
    num_tiles = na_pad // tm
    num_ktiles = nc_pad // tk

    est = vmem_est(tm, tk)
    compiler_kwargs = dict(dimension_semantics=("parallel", "arbitrary"))
    if est > 12 * _MIB:   # v5e's default scoped limit is only 16 MiB
        limit_cap = (56 if is_v7 else 100) * _MIB
        compiler_kwargs["vmem_limit_bytes"] = int(
            min(limit_cap, max(32 * _MIB, int(1.5 * est))))
    compiler_params = pltpu.CompilerParams(**compiler_kwargs)

    # --- padded device inputs ---------------------------------------------------
    def pad2(x, rows, cols, fill=0):
        pr, pc = rows - x.shape[0], cols - x.shape[1]
        if pr or pc:
            x = jnp.pad(x, ((0, pr), (0, pc)), constant_values=fill)
        return x

    anchor_bf16 = pad2(anchor_feature.astype(jnp.bfloat16), na_pad, dim_pad)
    contrast_bf16 = pad2(contrast_feature.astype(jnp.bfloat16), nc_pad, dim_pad)
    inv_den_p = pad2(inv_den, na_pad, 1)   # padded rows -> 0 (zeroed in-kernel)

    inv_temp = 1.0 / float(temperature)
    # Fold temperature/base_temperature and the 1/Na mean into one constant.
    scale = float(temperature) / float(base_temperature) / float(na)

    grid = (num_tiles, num_ktiles)
    out_shape = jax.ShapeDtypeStruct((num_tiles, 8, 128), jnp.float32)
    out_spec = pl.BlockSpec((1, 8, 128), lambda i, k: (i, 0, 0))
    anchor_spec = pl.BlockSpec((tm, dim_pad), lambda i, k: (i, 0))
    contrast_spec = pl.BlockSpec((tk, dim_pad), lambda i, k: (k, 0))
    invden_spec = pl.BlockSpec((tm, 1), lambda i, k: (i, 0))
    scratch = [pltpu.VMEM((tm, 1), jnp.float32)] * 3   # m, l, sum(mask*logits)

    if use_labels:
        alab = jnp.tile(labels_eff, anchor_count).reshape(-1, 1)     # (na, 1)
        alab = pad2(alab, na_pad, 1, fill=-1)
        clab = jnp.tile(labels_eff, n_views).reshape(1, -1)          # (1, nc)
        clab = pad2(clab, 1, nc_pad, fill=-1)

        kernel = functools.partial(_supcon_kernel_labels, na=na, nc=nc,
                                   inv_temp=inv_temp, scale=scale,
                                   exp_dtype=exp_dtype)
        per_tile = pl.pallas_call(
            kernel,
            out_shape=out_shape,
            grid=grid,
            in_specs=[
                pl.BlockSpec((tm, 1), lambda i, k: (i, 0)),   # anchor labels
                pl.BlockSpec((1, tk), lambda i, k: (0, k)),   # contrast labels
                invden_spec,
                anchor_spec,
                contrast_spec,
            ],
            out_specs=out_spec,
            scratch_shapes=scratch,
            compiler_params=compiler_params,
        )(alab, clab, inv_den_p, anchor_bf16, contrast_bf16)
    else:
        mask_full = jnp.tile(mask_bool, (anchor_count, n_views)).astype(jnp.int8)
        mask_full = pad2(mask_full, na_pad, nc_pad, fill=0)

        kernel = functools.partial(_supcon_kernel_mask, na=na, nc=nc,
                                   inv_temp=inv_temp, scale=scale,
                                   exp_dtype=exp_dtype)
        per_tile = pl.pallas_call(
            kernel,
            out_shape=out_shape,
            grid=grid,
            in_specs=[
                pl.BlockSpec((tm, tk), lambda i, k: (i, k)),  # int8 tiled mask
                invden_spec,
                anchor_spec,
                contrast_spec,
            ],
            out_specs=out_spec,
            scratch_shapes=scratch,
            compiler_params=compiler_params,
        )(mask_full, inv_den_p, anchor_bf16, contrast_bf16)

    # Each (8,128) output tile is a broadcast of that row tile's partial sum.
    return jnp.sum(per_tile[:, 0, 0])


# ---------------------------------------------------------------------------
# Pure-JAX reference (mirrors the PyTorch forward)
# ---------------------------------------------------------------------------
def _reference_supcon(features, labels=None, mask=None, *,
                      temperature=0.07, contrast_mode='all',
                      base_temperature=0.07, matmul_dtype=jnp.float32):
    if features.ndim > 3:
        features = features.reshape(features.shape[0], features.shape[1], -1)
    bsz, n_views, _ = features.shape
    if labels is None and mask is None:
        mask = jnp.eye(bsz, dtype=jnp.float32)
    elif labels is not None:
        labels = jnp.asarray(labels).reshape(-1, 1)
        mask = (labels == labels.T).astype(jnp.float32)
    else:
        mask = jnp.asarray(mask).astype(jnp.float32)
    contrast_feature = jnp.concatenate(
        [features[:, v, :] for v in range(n_views)], axis=0)
    if contrast_mode == 'one':
        anchor_feature, anchor_count = features[:, 0, :], 1
    else:
        anchor_feature, anchor_count = contrast_feature, n_views
    logits = jnp.dot(anchor_feature.astype(matmul_dtype),
                     contrast_feature.astype(matmul_dtype).T,
                     preferred_element_type=jnp.float32) / temperature
    logits = logits - jnp.max(logits, axis=1, keepdims=True)
    mask = jnp.tile(mask, (anchor_count, n_views))
    na = anchor_count * bsz
    logits_mask = 1.0 - jnp.eye(na, n_views * bsz, dtype=jnp.float32)
    mask = mask * logits_mask
    exp_logits = jnp.exp(logits) * logits_mask
    log_prob = logits - jnp.log(jnp.sum(exp_logits, axis=1, keepdims=True))
    mean_log_prob_pos = jnp.sum(mask * log_prob, axis=1) / jnp.sum(mask, axis=1)
    loss = -(temperature / base_temperature) * mean_log_prob_pos
    return jnp.mean(loss)


if __name__ == "__main__":
    key = jax.random.PRNGKey(0)
    k1, k2 = jax.random.split(key)

    bsz, n_views, dim = 8, 2, 32
    features = jax.random.normal(k1, (bsz, n_views, dim), dtype=jnp.float32)
    # L2-normalize along the feature dim (standard SupCon usage).
    features = features / jnp.linalg.norm(features, axis=-1, keepdims=True)
    labels = jax.random.randint(k2, (bsz,), 0, 4)
    label_mask = (labels[:, None] == labels[None, :]).astype(jnp.float32)

    # Supervised (labels), unsupervised (SimCLR), 'one' mode, explicit mask.
    loss_sup = supcon_loss(features, labels=labels)
    loss_unsup = supcon_loss(features)
    loss_one = supcon_loss(features, labels=labels, contrast_mode='one')
    loss_mask = supcon_loss(features, mask=label_mask)
    jax.block_until_ready((loss_sup, loss_unsup, loss_one, loss_mask))

    # Sanity check against the pure-JAX reference (bf16 matmul to match the
    # kernel's MXU path; exp may be bf16 on v6e/v7x -> slightly loose tol).
    ref = functools.partial(_reference_supcon, matmul_dtype=jnp.bfloat16)
    checks = [
        ("sup", loss_sup, ref(features, labels=labels)),
        ("unsup", loss_unsup, ref(features)),
        ("one", loss_one, ref(features, labels=labels, contrast_mode='one')),
        ("mask", loss_mask, ref(features, mask=label_mask)),
    ]
    for name, got, want in checks:
        assert jnp.allclose(got, want, atol=1e-2, rtol=1e-2), (name, got, want)

    print("KERNEL_OK")
</pallas_src>

<mosaic_0001>
module attributes {stable_mosaic.version = 11 : i64} {
  func.func @_supcon_kernel_labels(%arg0: i32, %arg1: i32, %arg2: memref<16x1xi32, #tpu.memory_space<vmem>>, %arg3: memref<1x128xi32, #tpu.memory_space<vmem>>, %arg4: memref<16x1xf32, #tpu.memory_space<vmem>>, %arg5: memref<16x128xbf16, #tpu.memory_space<vmem>>, %arg6: memref<128x128xbf16, #tpu.memory_space<vmem>>, %arg7: memref<1x8x128xf32, #tpu.memory_space<vmem>>, %arg8: memref<16x1xf32, #tpu.memory_space<vmem>>, %arg9: memref<16x1xf32, #tpu.memory_space<vmem>>, %arg10: memref<16x1xf32, #tpu.memory_space<vmem>>) attributes {dimension_semantics = [#tpu.dimension_semantics<parallel>, #tpu.dimension_semantics<arbitrary>], iteration_bounds = array<i64: 1, 1>, scalar_prefetch = 0 : i64, scratch_operands = 3 : i64, tpu.core_type = #tpu.core_type<tc>, window_params = [{transform_indices = @transform_0, window_bounds = array<i64: 16, 1>}, {transform_indices = @transform_1, window_bounds = array<i64: 1, 128>}, {transform_indices = @transform_2, window_bounds = array<i64: 16, 1>}, {transform_indices = @transform_3, window_bounds = array<i64: 16, 128>}, {transform_indices = @transform_4, window_bounds = array<i64: 128, 128>}, {transform_indices = @transform_5, window_bounds = array<i64: 1, 8, 128>}]} {
    %c0 = arith.constant 0 : index
    %c0_0 = arith.constant 0 : index
    %0 = vector.load %arg5[%c0, %c0_0] : memref<16x128xbf16, #tpu.memory_space<vmem>>, vector<16x128xbf16>
    %c0_1 = arith.constant 0 : index
    %c0_2 = arith.constant 0 : index
    %1 = vector.load %arg6[%c0_1, %c0_2] : memref<128x128xbf16, #tpu.memory_space<vmem>>, vector<128x128xbf16>
    %cst = arith.constant dense<0.000000e+00> : vector<16x128xf32>
    %2 = tpu.matmul %0, %1, %cst {dimension_numbers = #tpu.dot_dimension_numbers<[1], [1], [0], [0], [0, 0, 1, 0], [], []>} : vector<16x128xbf16>, vector<128x128xbf16>, vector<16x128xf32> -> vector<16x128xf32>
    %cst_3 = arith.constant 14.2857141 : f32
    %3 = vector.broadcast %cst_3 : f32 to vector<16x128xf32>
    %4 = arith.mulf %2, %3 : vector<16x128xf32>
    %c16_i32 = arith.constant 16 : i32
    %5 = arith.muli %arg0, %c16_i32 : i32
    %6 = tpu.iota {dimensions = array<i32: 0>} : vector<16x128xi32>
    %7 = vector.broadcast %5 : i32 to vector<16x128xi32>
    %8 = arith.addi %7, %6 : vector<16x128xi32>
    %c128_i32 = arith.constant 128 : i32
    %9 = arith.muli %arg1, %c128_i32 : i32
    %10 = tpu.iota {dimensions = array<i32: 1>} : vector<16x128xi32>
    %11 = vector.broadcast %9 : i32 to vector<16x128xi32>
    %12 = arith.addi %11, %10 : vector<16x128xi32>
    %13 = arith.cmpi ne, %8, %12 : vector<16x128xi32>
    %c16_i32_4 = arith.constant 16 : i32
    %14 = vector.broadcast %c16_i32_4 : i32 to vector<16x128xi32>
    %15 = arith.cmpi slt, %12, %14 : vector<16x128xi32>
    %16 = arith.andi %13, %15 : vector<16x128xi1>
    %c0_5 = arith.constant 0 : index
    %c0_6 = arith.constant 0 : index
    %17 = vector.load %arg2[%c0_5, %c0_6] : memref<16x1xi32, #tpu.memory_space<vmem>>, vector<16x1xi32>
    %c0_7 = arith.constant 0 : index
    %c0_8 = arith.constant 0 : index
    %18 = vector.load %arg3[%c0_7, %c0_8] : memref<1x128xi32, #tpu.memory_space<vmem>>, vector<1x128xi32>
    %19 = vector.broadcast %17 : vector<16x1xi32> to vector<16x128xi32>
    %20 = vector.broadcast %18 : vector<1x128xi32> to vector<16x128xi32>
    %21 = arith.cmpi eq, %19, %20 : vector<16x128xi32>
    %22 = arith.andi %21, %16 : vector<16x128xi1>
    %c0_i32 = arith.constant 0 : i32
    %23 = arith.cmpi eq, %arg1, %c0_i32 : i32
    %24 = arith.extui %23 : i1 to i32
    %c0_i32_9 = arith.constant 0 : i32
    %25 = arith.cmpi ne, %24, %c0_i32_9 : i32
    scf.if %25 {
      %cst_29 = arith.constant 0xFF800000 : f32
      %54 = vector.broadcast %cst_29 : f32 to vector<16x1xf32>
      %c0_30 = arith.constant 0 : index
      %c0_31 = arith.constant 0 : index
      %55 = vector.load %arg8[%c0_30, %c0_31] : memref<16x1xf32, #tpu.memory_space<vmem>>, vector<16x1xf32>
      tpu.vector_store %arg8[%c0_30, %c0_31], %54 {strides = array<i32>} : memref<16x1xf32, #tpu.memory_space<vmem>>, vector<16x1xf32>,
      %cst_32 = arith.constant 0.000000e+00 : f32
      %56 = vector.broadcast %cst_32 : f32 to vector<16x1xf32>
      %c0_33 = arith.constant 0 : index
      %c0_34 = arith.constant 0 : index
      %57 = vector.load %arg9[%c0_33, %c0_34] : memref<16x1xf32, #tpu.memory_space<vmem>>, vector<16x1xf32>
      tpu.vector_store %arg9[%c0_33, %c0_34], %56 {strides = array<i32>} : memref<16x1xf32, #tpu.memory_space<vmem>>, vector<16x1xf32>,
      %cst_35 = arith.constant 0.000000e+00 : f32
      %58 = vector.broadcast %cst_35 : f32 to vector<16x1xf32>
      %c0_36 = arith.constant 0 : index
      %c0_37 = arith.constant 0 : index
      %59 = vector.load %arg10[%c0_36, %c0_37] : memref<16x1xf32, #tpu.memory_space<vmem>>, vector<16x1xf32>
      tpu.vector_store %arg10[%c0_36, %c0_37], %58 {strides = array<i32>} : memref<16x1xf32, #tpu.memory_space<vmem>>, vector<16x1xf32>,
    } else {
    }
    %c0_10 = arith.constant 0 : index
    %c0_11 = arith.constant 0 : index
    %26 = vector.load %arg8[%c0_10, %c0_11] : memref<16x1xf32, #tpu.memory_space<vmem>>, vector<16x1xf32>
    %cst_12 = arith.constant dense<0xFF800000> : vector<16xf32>
    %27 = vector.multi_reduction <maximumf>, %4, %cst_12 [1] : vector<16x128xf32> to vector<16xf32>
    %28 = vector.shape_cast %27 : vector<16xf32> to vector<16x1xf32>
    %29 = arith.maximumf %26, %28 : vector<16x1xf32>
    %30 = arith.subf %26, %29 : vector<16x1xf32>
    %31 = math.exp %30 : vector<16x1xf32>
    %32 = vector.broadcast %29 : vector<16x1xf32> to vector<16x128xf32>
    %33 = arith.subf %4, %32 : vector<16x128xf32>
    %34 = math.exp %33 : vector<16x128xf32>
    %c0_13 = arith.constant 0 : index
    %c0_14 = arith.constant 0 : index
    %35 = vector.load %arg9[%c0_13, %c0_14] : memref<16x1xf32, #tpu.memory_space<vmem>>, vector<16x1xf32>
    %36 = arith.mulf %31, %35 : vector<16x1xf32>
    %cst_15 = arith.constant 0.000000e+00 : f32
    %37 = vector.broadcast %cst_15 : f32 to vector<16x128xf32>
    %38 = arith.select %16, %34, %37 : vector<16x128xi1>, vector<16x128xf32>
    %cst_16 = arith.constant dense<0.000000e+00> : vector<16xf32>
    %39 = vector.multi_reduction <add>, %38, %cst_16 [1] : vector<16x128xf32> to vector<16xf32>
    %40 = vector.shape_cast %39 : vector<16xf32> to vector<16x1xf32>
    %41 = arith.addf %36, %40 : vector<16x1xf32>
    %c0_17 = arith.constant 0 : index
    %c0_18 = arith.constant 0 : index
    %42 = vector.load %arg9[%c0_17, %c0_18] : memref<16x1xf32, #tpu.memory_space<vmem>>, vector<16x1xf32>
    tpu.vector_store %arg9[%c0_17, %c0_18], %41 {strides = array<i32>} : memref<16x1xf32, #tpu.memory_space<vmem>>, vector<16x1xf32>,
    %c0_19 = arith.constant 0 : index
    %c0_20 = arith.constant 0 : index
    %43 = vector.load %arg10[%c0_19, %c0_20] : memref<16x1xf32, #tpu.memory_space<vmem>>, vector<16x1xf32>
    %cst_21 = arith.constant 0.000000e+00 : f32
    %44 = vector.broadcast %cst_21 : f32 to vector<16x128xf32>
    %45 = arith.select %22, %4, %44 : vector<16x128xi1>, vector<16x128xf32>
    %cst_22 = arith.constant dense<0.000000e+00> : vector<16xf32>
    %46 = vector.multi_reduction <add>, %45, %cst_22 [1] : vector<16x128xf32> to vector<16xf32>
    %47 = vector.shape_cast %46 : vector<16xf32> to vector<16x1xf32>
    %48 = arith.addf %43, %47 : vector<16x1xf32>
    %c0_23 = arith.constant 0 : index
    %c0_24 = arith.constant 0 : index
    %49 = vector.load %arg10[%c0_23, %c0_24] : memref<16x1xf32, #tpu.memory_space<vmem>>, vector<16x1xf32>
    tpu.vector_store %arg10[%c0_23, %c0_24], %48 {strides = array<i32>} : memref<16x1xf32, #tpu.memory_space<vmem>>, vector<16x1xf32>,
    %c0_25 = arith.constant 0 : index
    %c0_26 = arith.constant 0 : index
    %50 = vector.load %arg8[%c0_25, %c0_26] : memref<16x1xf32, #tpu.memory_space<vmem>>, vector<16x1xf32>
    tpu.vector_store %arg8[%c0_25, %c0_26], %29 {strides = array<i32>} : memref<16x1xf32, #tpu.memory_space<vmem>>, vector<16x1xf32>,
    %c0_i32_27 = arith.constant 0 : i32
    %51 = arith.cmpi eq, %arg1, %c0_i32_27 : i32
    %52 = arith.extui %51 : i1 to i32
    %c0_i32_28 = arith.constant 0 : i32
    %53 = arith.cmpi ne, %52, %c0_i32_28 : i32
    scf.if %53 {
      %c0_29 = arith.constant 0 : index
      %c0_30 = arith.constant 0 : index
      %54 = vector.load %arg10[%c0_29, %c0_30] : memref<16x1xf32, #tpu.memory_space<vmem>>, vector<16x1xf32>
      %c0_31 = arith.constant 0 : index
      %c0_32 = arith.constant 0 : index
      %55 = vector.load %arg4[%c0_31, %c0_32] : memref<16x1xf32, #tpu.memory_space<vmem>>, vector<16x1xf32>
      %56 = arith.mulf %54, %55 : vector<16x1xf32>
      %c0_33 = arith.constant 0 : index
      %c0_34 = arith.constant 0 : index
      %57 = vector.load %arg8[%c0_33, %c0_34] : memref<16x1xf32, #tpu.memory_space<vmem>>, vector<16x1xf32>
      %58 = arith.subf %56, %57 : vector<16x1xf32>
      %c0_35 = arith.constant 0 : index
      %c0_36 = arith.constant 0 : index
      %59 = vector.load %arg9[%c0_35, %c0_36] : memref<16x1xf32, #tpu.memory_space<vmem>>, vector<16x1xf32>
      %60 = math.log %59 : vector<16x1xf32>
      %61 = arith.subf %58, %60 : vector<16x1xf32>
      %cst_37 = arith.constant -6.250000e-02 : f32
      %62 = vector.broadcast %cst_37 : f32 to vector<16x1xf32>
      %63 = arith.mulf %62, %61 : vector<16x1xf32>
      %c16_i32_38 = arith.constant 16 : i32
      %64 = arith.muli %arg0, %c16_i32_38 : i32
      %65 = tpu.iota {dimensions = array<i32: 0>} : vector<16x1xi32>
      %66 = vector.broadcast %64 : i32 to vector<16x1xi32>
      %67 = arith.addi %66, %65 : vector<16x1xi32>
      %c16_i32_39 = arith.constant 16 : i32
      %68 = vector.broadcast %c16_i32_39 : i32 to vector<16x1xi32>
      %69 = arith.cmpi slt, %67, %68 : vector<16x1xi32>
      %cst_40 = arith.constant 0.000000e+00 : f32
      %70 = vector.broadcast %cst_40 : f32 to vector<16x1xf32>
      %71 = arith.select %69, %63, %70 : vector<16x1xi1>, vector<16x1xf32>
      %72 = vector.shape_cast %71 : vector<16x1xf32> to vector<1x16x1xf32>
      %cst_41 = arith.constant dense<0.000000e+00> : vector<1xf32>
      %73 = vector.multi_reduction <add>, %72, %cst_41 [1, 2] : vector<1x16x1xf32> to vector<1xf32>
      %74 = vector.shape_cast %73 : vector<1xf32> to vector<1x1x1xf32>
      %75 = vector.extract %74[0, 0, 0] : f32 from vector<1x1x1xf32>
      %76 = vector.broadcast %75 : f32 to vector<1x8x128xf32>
      %c0_42 = arith.constant 0 : index
      %c0_43 = arith.constant 0 : index
      %c0_44 = arith.constant 0 : index
      %77 = vector.load %arg7[%c0_42, %c0_43, %c0_44] : memref<1x8x128xf32, #tpu.memory_space<vmem>>, vector<1x8x128xf32>
      tpu.vector_store %arg7[%c0_42, %c0_43, %c0_44], %76 {strides = array<i32>} : memref<1x8x128xf32, #tpu.memory_space<vmem>>, vector<1x8x128xf32>,
    } else {
    }
    return
  }
  func.func @transform_0(%arg0: i32, %arg1: i32) -> (i32, i32) {
    %c0_i32 = arith.constant 0 : i32
    %c0_i32_0 = arith.constant 0 : i32
    return %arg0, %c0_i32 : i32, i32
  }
  func.func @transform_1(%arg0: i32, %arg1: i32) -> (i32, i32) {
    %c0_i32 = arith.constant 0 : i32
    %c0_i32_0 = arith.constant 0 : i32
    return %c0_i32, %arg1 : i32, i32
  }
  func.func @transform_2(%arg0: i32, %arg1: i32) -> (i32, i32) {
    %c0_i32 = arith.constant 0 : i32
    %c0_i32_0 = arith.constant 0 : i32
    return %arg0, %c0_i32 : i32, i32
  }
  func.func @transform_3(%arg0: i32, %arg1: i32) -> (i32, i32) {
    %c0_i32 = arith.constant 0 : i32
    %c0_i32_0 = arith.constant 0 : i32
    return %arg0, %c0_i32 : i32, i32
  }
  func.func @transform_4(%arg0: i32, %arg1: i32) -> (i32, i32) {
    %c0_i32 = arith.constant 0 : i32
    %c0_i32_0 = arith.constant 0 : i32
    return %arg1, %c0_i32 : i32, i32
  }
  func.func @transform_5(%arg0: i32, %arg1: i32) -> (i32, i32, i32) {
    %c0_i32 = arith.constant 0 : i32
    %c0_i32_0 = arith.constant 0 : i32
    %c0_i32_1 = arith.constant 0 : i32
    return %arg0, %c0_i32, %c0_i32_0 : i32, i32, i32
  }
}

</mosaic_0001>

<bundles_post_ra>
// kernel: tpu_custom_call.1
= control target key start
LH: loop header
LB: loop body
LE: loop exit
PB: predicated region body
PF: predicated region fallthrough
CT: control target
= control target key end

     0   :  { %10 = vsyncpa [#allocation6], 0  ;;  %s535_s0 = inlined_call_operand.vmem [shape: s32[16,1], index: 0, kind: input, shape index: {}]   ;;  %s536_s1 = inlined_call_operand.vmem [shape: s32[1,128], index: 1, kind: input, shape index: {}]   ;;  %s537_s2 = inlined_call_operand.vmem [shape: f32[16,1], index: 2, kind: input, shape index: {}]   ;;  %s538_s3 = inlined_call_operand.vmem [shape: bf16[16,128], index: 3, kind: input, shape index: {}]   ;;  %s539_s4 = inlined_call_operand.hbm [shape: bf16[128,128], index: 4, kind: input, shape index: {}]   ;;  %s540_s5 = inlined_call_operand.hbm [shape: f32[1,8,128], index: 5, kind: output, shape index: {}]  }
   0x1   :  { %11 = vsyncpa [#allocation7], 0  ;;  %s431_s18 = smov [#allocation5]   ;;  %s383_s22 = scalar_lea.hbm %s539_s4, 1024 }
   0x2   :  { %s25_s19 = sshll.u32 %s431_s18, 4  ;;  %p384_p0 = scmp.ne.s32.totalorder %s539_s4, %s383_s22  ;;  %s26_s19 = int_to_ptr.vmem [resolvable:$true] %s25_s19 }
   0x3   :  { %p387_p1 = scmp.lt.u32.totalorder %s383_s22, %s539_s4 }
   0x5   :  { %p389_p2 = pnand %p387_p1, %p384_p0 }
   0x7   :  { %392 = shalt.err (!%p389_p2)
}
   0x8   :  { %s393_s27 = scalar_lea.vmem %s26_s19, 1024  ;;  %p398_p4 = scmp.lt.s32.totalorder %s26_s19, %s26_s19 }
   0x9   :  { %p394_p3 = scmp.ne.s32.totalorder %s26_s19, %s393_s27  ;;  %p399_p5 = scmp.lt.s32.totalorder %s393_s27, %s393_s27 }
   0xb   :  { %p400_p6 = por %p399_p5, %p398_p4 }
   0xd   :  { %p401_p7 = pnand %p400_p6, %p394_p3 }
   0xf   :  { %404 = shalt.err (!%p401_p7)
}
  0x10   :  { %s432_s28 = smov 64   ;;  %s433_s29 = smov 4  }
  0x11   :  { %31 = dma.hbm_to_vmem [thread:$0]  %s539_s4, 1024, %s26_s19, [#allocation6], %s432_s28, %s432_s28, %s433_s29  }
  0x12   :  { %427 = dma.done.wait [#allocation6], 1024  }
  0x13   :  { %428 = vsyncadd [#allocation6], 4294966272  ;;  %v434_v0 = vmov 0.0   ;;  %vm435_vm0 = vmmov 0   ;;  %v362_v1 = vld [vmem:[#allocation5] sm:$0xff]   ;;  %v363_v2 = vld [vmem:[#allocation5 + $0x8] sm:$0xff]   ;;  %v152_v21 = vlaneseq }
  0x14   :  { %330 = vmatprep.subr.bf16.mxu0 %v434_v0  ;;  %346 = vmatprep.mubr.msk.bf16.mxu0 %vm435_vm0, %v434_v0  ;;  %v364_v3 = vld [vmem:[#allocation5 + $0x10] sm:$0xff]   ;;  %v365_v4 = vld [vmem:[#allocation5 + $0x18] sm:$0xff]   ;;  %v366_v5 = vld [vmem:[#allocation5 + $0x20] sm:$0xff]   ;;  %v436_v10 = vmov 0   ;;  %vm189_vm1 = vcmask 7168   ;;  %v437_v11 = vmov -inf  }
  0x15   :  { %331 = vmatpush3.bf16.xpose.msra.mxu0 %v362_v1  ;;  %v367_v6 = vld [vmem:[#allocation5 + $0x28] sm:$0xff]   ;;  %v368_v7 = vld [vmem:[#allocation5 + $0x30] sm:$0xff]   ;;  %v369_v8 = vld [vmem:[#allocation5 + $0x38] sm:$0xff]   ;;  %361 = vset.pattern.permute.xlu0 %v436_v10  ;;  %190 = vst.msk [vmem:[#allocation2] sm:$0xff] %vm189_vm1, %v437_v11  ;;  %v153_v26 = vshrl.u32 %v152_v21, 7  ;;  %v160_v27 = vand.u32 127, %v152_v21 }
  0x16   :  { %332 = vmatprep.subr.bf16.mxu0 %v434_v0  ;;  %v370_v9 = vld [vmem:[%s538_s3] sm:$0xff]   ;;  %360 = vset.pattern.permute.xlu1 %v436_v10  ;;  %191 = vst.msk [vmem:[#allocation2 + $0x8] sm:$0xff] %vm189_vm1, %v437_v11  ;;  %192 = vst.msk [vmem:[#allocation3] sm:$0xff] %vm189_vm1, %v434_v0  ;;  %v169_v30 = vld [vmem:[%s535_s0 + $0x8] sm:$0xff] }
  0x17   :  { %193 = vst.msk [vmem:[#allocation3 + $0x8] sm:$0xff] %vm189_vm1, %v434_v0  ;;  %194 = vst.msk [vmem:[#allocation4] sm:$0xff] %vm189_vm1, %v434_v0  ;;  %v168_v18 = vld [vmem:[%s535_s0] sm:$0xff]  ;;  %vm163_vm2 = vcmp.ne.s32.totalorder %v153_v26, %v160_v27  ;;  %vm165_vm3 = vcmp.lt.s32.totalorder %v160_v27, 16  ;;  %v154_v41 = vadd.s32 8, %v153_v26 }
  0x18   :  { %195 = vst.msk [vmem:[#allocation4 + $0x8] sm:$0xff] %vm189_vm1, %v434_v0  ;;  %v320_v31 = vld [vmem:[%s536_s1] ss:$0 sm:$0xff]  ;;  %vm502_vm4 = vmand %vm163_vm2, %vm165_vm3 }
  0x19   :  { %vm164_vm7 = vcmp.ne.s32.totalorder %v154_v41, %v160_v27 }
  0x1a   :  { %vm167_vm9 = vmand %vm164_vm7, %vm165_vm3 }
  0x1c   :  { %v196_v19 = vld [vmem:[#allocation2] sm:$0xff] }
  0x1d   :  { %333 = vmatpush3.bf16.xpose.msra.mxu0 %v363_v2  ;;  %v197_v23 = vld [vmem:[#allocation2 + $0x8] sm:$0xff]  ;;  %v226_v54 = vld [vmem:[#allocation3] sm:$0xff] }
  0x1e   :  { %334 = vmatprep.subr.bf16.mxu0 %v434_v0  ;;  %v241_v48 = vld [vmem:[#allocation4] sm:$0xff]  ;;  %v227_v58 = vld [vmem:[#allocation3 + $0x8] sm:$0xff] }
  0x1f   :  { %v242_v63 = vld [vmem:[#allocation4 + $0x8] sm:$0xff] }
  0x25   :  { %335 = vmatpush3.bf16.xpose.msra.mxu0 %v364_v3 }
  0x26   :  { %336 = vmatprep.subr.bf16.mxu0 %v434_v0 }
  0x2d   :  { %337 = vmatpush3.bf16.xpose.msra.mxu0 %v365_v4 }
  0x2e   :  { %338 = vmatprep.subr.bf16.mxu0 %v434_v0 }
  0x35   :  { %339 = vmatpush3.bf16.xpose.msra.mxu0 %v366_v5  ;;  %v260_v5 = vld [vmem:[%s537_s2] sm:$0xff] }
  0x36   :  { %340 = vmatprep.subr.bf16.mxu0 %v434_v0 }
  0x3d   :  { %341 = vmatpush3.bf16.xpose.msra.mxu0 %v367_v6 }
  0x3e   :  { %342 = vmatprep.subr.bf16.mxu0 %v434_v0 }
  0x45   :  { %343 = vmatpush3.bf16.xpose.msra.mxu0 %v368_v7 }
  0x46   :  { %344 = vmatprep.subr.bf16.mxu0 %v434_v0 }
  0x4d   :  { %345 = vmatpush3.bf16.xpose.msra.mxu0 %v369_v8  ;;  %v261_v8 = vld [vmem:[%s537_s2 + $0x8] sm:$0xff]  ;;  %s438_s2 = smov [#allocation8]  }
  0x4e   :  { %s302_s15 = sshll.u32 %s438_s2, 4  ;;  %s303_s15 = int_to_ptr.vmem [resolvable:$true] %s302_s15 }
  0x4f   :  { %s405_s17 = scalar_lea.vmem %s303_s15, 128  ;;  %p410_p9 = scmp.lt.s32.totalorder %s303_s15, %s303_s15 }
  0x50   :  { %p406_p8 = scmp.ne.s32.totalorder %s303_s15, %s405_s17  ;;  %p411_p10 = scmp.lt.s32.totalorder %s405_s17, %s405_s17 }
  0x52   :  { %p412_p11 = por %p411_p10, %p410_p9 }
  0x54   :  { %347 = vmatmul.mubr.bf16.vlgmr.msra.gmra.mrb[0].mxu0 %v370_v9  ;;  %p413_p12 = pnand %p412_p11, %p406_p8 }
 0x127   :  { %v142_v12 = vpop.f32.mrb[0].mxu0 }
 0x128   :  { %v149_v13 = vmul.f32 14.285714, %v142_v12  ;;  %v348_v14 = vpop.f32.mrb[1].mxu0 }
 0x129   :  { %v145_v15 = vpop.f32.mrb[2].mxu0 }
 0x12a   :  { %198 = vmax.xlane.f32.xlu0 %v149_v13  ;;  %v349_v16 = vpop.f32.mrb[3].mxu0  ;;  %v150_v17 = vmul.f32 14.285714, %v145_v15 }
 0x12e   :  { %200 = vmax.xlane.f32.xlu0 %v150_v17 }
 0x144   :  { %172 = vperm.xlu0 %361, %v168_v18  }
 0x1b7   :  { %v199_v20 = vpop.xlane.xlu0 %198 }
 0x1b8   :  { %v202_v22 = vmax.f32 %v196_v19, %v199_v20 }
 0x1ba   :  { %v204_v24 = vsub.f32 %v196_v19, %v202_v22  ;;  %253 = vst.msk [vmem:[#allocation2] sm:$0xff] %vm189_vm1, %v202_v22  ;;  %212 = vperm.xlu1 %360, %v202_v22  }
 0x1bb   :  { %v201_v25 = vpop.xlane.xlu0 %200 }
 0x1bc   :  { %v203_v28 = vmax.f32 %v197_v23, %v201_v25  ;;  %v206_v51 = vmul.f32 1.442695, %v204_v24 }
 0x1be   :  { %v205_v29 = vsub.f32 %v197_v23, %v203_v28  ;;  %254 = vst.msk [vmem:[#allocation2 + $0x8] sm:$0xff] %vm189_vm1, %v203_v28  ;;  %217 = vperm.xlu1 %360, %v203_v28  }
 0x1c0   :  { %v208_v52 = vmul.f32 1.442695, %v205_v29 }
 0x1c1   :  { %v264_v10 = vld [vmem:[#allocation2] sm:$0xff] }
 0x1c2   :  { %175 = vperm.xlu1 %360, %v169_v30  }
 0x1c3   :  { %v173_v33 = vpop.permute.xlu0 %172 }
 0x1c4   :  { %vm181_vm5 = vcmp.eq.s32.totalorder %v173_v33, %v320_v31 }
 0x1c5   :  { %vm183_vm6 = vmand %vm181_vm5, %vm502_vm4  ;;  %v265_v16 = vld [vmem:[#allocation2 + $0x8] sm:$0xff] }
 0x1c6   :  { %v243_v34 = vsel %vm183_vm6, %v149_v13, 0.0 }
 0x1c7   :  { %245 = vadd.xlane.f32.xlu0 %v243_v34 }
 0x239   :  { %v213_v35 = vpop.permute.xlu1 %212 }
 0x23a   :  { %v220_v36 = vsub.f32 %v149_v13, %v213_v35 }
 0x23c   :  { %v222_v37 = vmul.f32 1.442695, %v220_v36 }
 0x23d   :  { %v218_v38 = vpop.permute.xlu1 %217 }
 0x23e   :  { %371 = vpow2.f32 %v222_v37  ;;  %v221_v39 = vsub.f32 %v150_v17, %v218_v38 }
 0x240   :  { %v224_v40 = vmul.f32 1.442695, %v221_v39 }
 0x241   :  { %v176_v43 = vpop.permute.xlu1 %175 }
 0x242   :  { %373 = vpow2.f32 %v224_v40  ;;  %vm182_vm8 = vcmp.eq.s32.totalorder %v176_v43, %v320_v31 }
 0x243   :  { %vm184_vm10 = vmand %vm182_vm8, %vm167_vm9  ;;  %375 = vpow2.f32 %v206_v51 }
 0x244   :  { %v244_v47 = vsel %vm184_vm10, %v150_v17, 0.0  ;;  %377 = vpow2.f32 %v208_v52 }
 0x248   :  { %v372_v42 = vpop.eup %371 }
 0x249   :  { %v230_v44 = vsel %vm502_vm4, %v372_v42, 0.0 }
 0x24a   :  { %232 = vadd.xlane.f32.xlu1 %v230_v44 }
 0x24c   :  { %v374_v45 = vpop.eup %373 }
 0x24d   :  { %v231_v46 = vsel %vm167_vm9, %v374_v45, 0.0  ;;  %v376_v53 = vpop.eup %375 }
 0x24e   :  { %234 = vadd.xlane.f32.xlu1 %v231_v46  ;;  %v228_v55 = vmul.f32 %v376_v53, %v226_v54  ;;  %v378_v56 = vpop.eup %377 }
 0x24f   :  { %v229_v60 = vmul.f32 %v378_v56, %v227_v58 }
 0x252   :  { %247 = vadd.xlane.f32.xlu1 %v244_v47 }
 0x254   :  { %v246_v49 = vpop.xlane.xlu0 %245 }
 0x255   :  { %v249_v50 = vadd.f32 %v246_v49, %v241_v48 }
 0x257   :  { %251 = vst.msk [vmem:[#allocation4] sm:$0xff] %vm189_vm1, %v249_v50 }
 0x25e   :  { %v258_v4 = vld [vmem:[#allocation4] sm:$0xff] }
 0x25f   :  { %v262_v6 = vmul.f32 %v260_v5, %v258_v4 }
 0x261   :  { %v266_v12 = vsub.f32 %v262_v6, %v264_v10 }
 0x2d7   :  { %v233_v57 = vpop.xlane.xlu1 %232 }
 0x2d8   :  { %v236_v59 = vadd.f32 %v233_v57, %v228_v55 }
 0x2da   :  { %239 = vst.msk [vmem:[#allocation3] sm:$0xff] %vm189_vm1, %v236_v59 }
 0x2db   :  { %v235_v61 = vpop.xlane.xlu1 %234 }
 0x2dc   :  { %v237_v62 = vadd.f32 %v235_v61, %v229_v60 }
 0x2de   :  { %240 = vst.msk [vmem:[#allocation3 + $0x8] sm:$0xff] %vm189_vm1, %v237_v62 }
 0x2df   :  { %v248_v0 = vpop.xlane.xlu1 %247 }
 0x2e0   :  { %v250_v1 = vadd.f32 %v248_v0, %v242_v63 }
 0x2e1   :  { %v268_v2 = vld [vmem:[#allocation3] sm:$0xff] }
 0x2e2   :  { %252 = vst.msk [vmem:[#allocation4 + $0x8] sm:$0xff] %vm189_vm1, %v250_v1  ;;  %379 = vlog2.f32 %v268_v2 }
 0x2e5   :  { %v269_v3 = vld [vmem:[#allocation3 + $0x8] sm:$0xff] }
 0x2e6   :  { %381 = vlog2.f32 %v269_v3 }
 0x2e9   :  { %v259_v7 = vld [vmem:[#allocation4 + $0x8] sm:$0xff] }
 0x2ea   :  { %v263_v11 = vmul.f32 %v261_v8, %v259_v7 }
 0x2ec   :  { %v380_v9 = vpop.eup %379  ;;  %v267_v17 = vsub.f32 %v263_v11, %v265_v16 }
 0x2ed   :  { %v271_v13 = vmul.f32 0.6931472, %v380_v9 }
 0x2ef   :  { %v274_v14 = vsub.f32 %v266_v12, %v271_v13 }
 0x2f0   :  { %v382_v15 = vpop.eup %381 }
 0x2f1   :  { %v273_v18 = vmul.f32 0.6931472, %v382_v15  ;;  %v276_v20 = vmul.f32 -0.0625, %v274_v14 }
 0x2f3   :  { %v275_v19 = vsub.f32 %v267_v17, %v273_v18  ;;  %v282_v22 = vsel %vm189_vm1, %v276_v20, 0.0 }
 0x2f5   :  { %v277_v21 = vmul.f32 -0.0625, %v275_v19 }
 0x2f7   :  { %v283_v23 = vsel %vm189_vm1, %v277_v21, 0.0 }
 0x2f8   :  { %v284_v24 = vadd.f32 %v283_v23, %v282_v22 }
 0x2fa   :  { %285 = vadd.xlane.f32.xlu1 %v284_v24 }
 0x387   :  { %v286_v25 = vpop.xlane.xlu1 %285 }
 0x388   :  { %v287_v26 = vrot.slane %v286_v25, 4 }
 0x38a   :  { %v288_v27 = vadd.f32 %v287_v26, %v286_v25 }
 0x38c   :  { %v289_v28 = vrot.slane %v288_v27, 2 }
 0x38e   :  { %v290_v29 = vadd.f32 %v289_v28, %v288_v27 }
 0x390   :  { %v291_v30 = vrot.slane %v290_v29, 1 }
 0x392   :  { %v292_v31 = vadd.f32 %v291_v30, %v290_v29 }
 0x394   :  { %350 = vpush %v292_v31 }
 0x3c5   :  { %s351_s16 = spop %350 }
 0x3c6   :  { %v294_v32 = vstv %s351_s16 }
 0x3c7   :  { %295 = vst [vmem:[#allocation8] sm:$0xff] %v294_v32 }
 0x3c8   :  { %416 = shalt.err (!%p413_p12)
}
 0x3c9   :  { %s417_s20 = scalar_lea.hbm %s540_s5, 128 }
 0x3ca   :  { %p418_p13 = scmp.ne.s32.totalorder %s540_s5, %s417_s20  ;;  %p421_p0 = scmp.lt.u32.totalorder %s417_s20, %s540_s5 }
 0x3cc   :  { %p423_p1 = pnand %p421_p0, %p418_p13 }
 0x3ce   :  { %426 = shalt.err (!%p423_p1)
}
 0x3cf   :  { %305 = dma.vmem_to_hbm [thread:$0]  %s303_s15, 128, %s540_s5, [#allocation7]  }
 0x3d0   :  { %429 = dma.done.wait [#allocation7], 128  }
 0x3d1   :  { %430 = vsyncadd [#allocation7], 4294967168 }
 0x3d2   :  { %309 = vsyncpa [#allocation6], 1 }
 0x3d3   :  { %310 = vsyncpa [#allocation7], 1 }

</bundles_post_ra>
